<compile_context>
chip_gen: v7x
topology: tpu7x:2x2x1
jax: 0.10.0
libtpu: 0.0.40
codegen_flags: <defaults>
</compile_context>

<pallas_src>
import jax
import jax.numpy as jnp
from jax.experimental import pallas as pl
from jax.experimental.pallas import tpu as pltpu

BETA_SCALE_NORM = 0.005
BETA_SCALE_POSTNORM = 1.0
KAPPA_SCALE = 0.1


def _model_contours_kernel(beta_raw_ref, kappa_raw_ref, radii_ref, angles_ref,
                           origin_ref, beta_ref, kappa_ref, xy_ref):
    # beta = tanh(out['beta'] * 0.005) * 1.0      (lane-dense (B, H*W) tile)
    beta_ref[...] = (jnp.tanh(beta_raw_ref[...] * BETA_SCALE_NORM)
                     * BETA_SCALE_POSTNORM)
    # kappa = out['kappa'] * 0.1
    kappa_ref[...] = kappa_raw_ref[...] * KAPPA_SCALE

    # contour[b, l, :] = init_contour_origin[b, :]
    #                    + [rho * cos(theta), rho * sin(theta)]
    r = radii_ref[...]          # (B, L)
    th = angles_ref[...]        # (B, L)
    ox = origin_ref[:, 0:1]     # (B, 1) — broadcasts over the L lane axis
    oy = origin_ref[:, 1:2]     # (B, 1)
    x = ox + r * jnp.cos(th)    # (B, L)
    y = oy + r * jnp.sin(th)    # (B, L)
    # Single lane-dense store: [init_x | init_y] along lanes -> (B, 2L).
    xy_ref[...] = jnp.concatenate([x, y], axis=-1)


def model_contours_forward(beta_raw, kappa_raw, data_map, init_contour_radii,
                           interp_angles, init_contour_origin):
    """Pallas version of ModelContours.forward's own compute."""
    B, H, W = beta_raw.shape
    _, L = init_contour_radii.shape
    HW = H * W

    # Lane-dense reshape of the single-channel maps (undone on the outputs).
    beta_raw_flat = beta_raw.reshape(B, HW)
    kappa_raw_flat = kappa_raw.reshape(B, HW)

    # Single-invocation grid; every block is the full array, so the
    # (8, 128) divisibility rule is trivially satisfied.
    map_spec = pl.BlockSpec((B, HW), lambda i: (0, 0))
    vec_spec = pl.BlockSpec((B, L), lambda i: (0, 0))
    origin_spec = pl.BlockSpec((B, 2), lambda i: (0, 0))
    xy_spec = pl.BlockSpec((B, 2 * L), lambda i: (0, 0))

    beta_flat, kappa_flat, contour_xy = pl.pallas_call(
        _model_contours_kernel,
        out_shape=(
            jax.ShapeDtypeStruct((B, HW), jnp.float32),
            jax.ShapeDtypeStruct((B, HW), jnp.float32),
            jax.ShapeDtypeStruct((B, 2 * L), jnp.float32),
        ),
        grid=(1,),
        in_specs=[map_spec, map_spec, vec_spec, vec_spec, origin_spec],
        out_specs=(map_spec, map_spec, xy_spec),
        compiler_params=pltpu.CompilerParams(
            dimension_semantics=("arbitrary",)),
    )(beta_raw_flat, kappa_raw_flat, init_contour_radii, interp_angles,
      init_contour_origin)

    beta = beta_flat.reshape(B, H, W)
    kappa = kappa_flat.reshape(B, H, W)
    init_x = contour_xy[:, :L]
    init_y = contour_xy[:, L:]

    loss = jnp.float32(0.0)  # TODO(synk): real loss comes from the external net
    out = {
        "beta": beta,
        "kappa": kappa,
        "data": data_map,   # passed through unchanged, as in the PyTorch code
        "init_x": init_x,
        "init_y": init_y,
    }
    return loss, out


def _reference_forward(beta_raw, kappa_raw, init_contour_radii, interp_angles,
                       init_contour_origin):
    """Plain-JAX reference mirroring the PyTorch semantics."""
    beta = jnp.tanh(beta_raw * BETA_SCALE_NORM) * BETA_SCALE_POSTNORM
    kappa = kappa_raw * KAPPA_SCALE
    rho_cos = init_contour_radii * jnp.cos(interp_angles)
    rho_sin = init_contour_radii * jnp.sin(interp_angles)
    joined = jnp.stack([rho_cos, rho_sin], axis=-1)            # (B, L, 2)
    origin = jnp.repeat(init_contour_origin[:, None, :],
                        joined.shape[1], axis=1)               # (B, L, 2)
    contour = origin + joined
    return beta, kappa, contour[..., 0], contour[..., 1]


if __name__ == "__main__":
    B, H, W, L = 2, 16, 16, 128

    key = jax.random.PRNGKey(0)
    k1, k2, k3, k4, k5, _ = jax.random.split(key, 6)

    # Synthetic stand-ins for the network outputs (deterministic).
    beta_raw = jax.random.normal(k1, (B, H, W), jnp.float32) * 50.0
    kappa_raw = jax.random.normal(k2, (B, H, W), jnp.float32)
    data_map = jax.random.normal(k3, (B, H, W), jnp.float32)

    # Contour sample inputs.
    init_contour_radii = jax.random.uniform(k4, (B, L), jnp.float32,
                                            minval=2.0, maxval=6.0)
    interp_angles = jnp.tile(
        jnp.linspace(0.0, 2.0 * jnp.pi, L, endpoint=False,
                     dtype=jnp.float32)[None, :], (B, 1))
    init_contour_origin = jax.random.uniform(k5, (B, 2), jnp.float32,
                                             minval=4.0, maxval=12.0)

    loss, out = model_contours_forward(beta_raw, kappa_raw, data_map,
                                       init_contour_radii, interp_angles,
                                       init_contour_origin)
    jax.block_until_ready(out)

    ref_beta, ref_kappa, ref_x, ref_y = _reference_forward(
        beta_raw, kappa_raw, init_contour_radii, interp_angles,
        init_contour_origin)

    assert out["beta"].shape == (B, H, W)
    assert out["kappa"].shape == (B, H, W)
    assert out["init_x"].shape == (B, L) and out["init_y"].shape == (B, L)
    assert jnp.allclose(out["beta"], ref_beta, atol=1e-5, rtol=1e-5)
    assert jnp.allclose(out["kappa"], ref_kappa, atol=1e-5, rtol=1e-5)
    assert jnp.allclose(out["init_x"], ref_x, atol=1e-4, rtol=1e-5)
    assert jnp.allclose(out["init_y"], ref_y, atol=1e-4, rtol=1e-5)

    print("KERNEL_OK")
</pallas_src>

<mosaic_0001>
module attributes {stable_mosaic.version = 11 : i64} {
  func.func @_model_contours_kernel(%arg0: i32, %arg1: memref<2x256xf32, #tpu.memory_space<vmem>>, %arg2: memref<2x256xf32, #tpu.memory_space<vmem>>, %arg3: memref<2x128xf32, #tpu.memory_space<vmem>>, %arg4: memref<2x128xf32, #tpu.memory_space<vmem>>, %arg5: memref<2x2xf32, #tpu.memory_space<vmem>>, %arg6: memref<2x256xf32, #tpu.memory_space<vmem>>, %arg7: memref<2x256xf32, #tpu.memory_space<vmem>>, %arg8: memref<2x256xf32, #tpu.memory_space<vmem>>) attributes {dimension_semantics = [#tpu.dimension_semantics<arbitrary>], iteration_bounds = array<i64: 1>, scalar_prefetch = 0 : i64, scratch_operands = 0 : i64, tpu.core_type = #tpu.core_type<tc>, window_params = [{pipeline_mode = #tpu.pipeline_mode<synchronous>, transform_indices = @transform_0, window_bounds = array<i64: 2, 256>}, {pipeline_mode = #tpu.pipeline_mode<synchronous>, transform_indices = @transform_1, window_bounds = array<i64: 2, 256>}, {pipeline_mode = #tpu.pipeline_mode<synchronous>, transform_indices = @transform_2, window_bounds = array<i64: 2, 128>}, {pipeline_mode = #tpu.pipeline_mode<synchronous>, transform_indices = @transform_3, window_bounds = array<i64: 2, 128>}, {pipeline_mode = #tpu.pipeline_mode<synchronous>, transform_indices = @transform_4, window_bounds = array<i64: 2, 2>}, {pipeline_mode = #tpu.pipeline_mode<synchronous>, transform_indices = @transform_5, window_bounds = array<i64: 2, 256>}, {pipeline_mode = #tpu.pipeline_mode<synchronous>, transform_indices = @transform_6, window_bounds = array<i64: 2, 256>}, {pipeline_mode = #tpu.pipeline_mode<synchronous>, transform_indices = @transform_7, window_bounds = array<i64: 2, 256>}]} {
    %c0 = arith.constant 0 : index
    %c0_0 = arith.constant 0 : index
    %0 = vector.load %arg1[%c0, %c0_0] : memref<2x256xf32, #tpu.memory_space<vmem>>, vector<2x256xf32>
    %cst = arith.constant 5.000000e-03 : f32
    %1 = vector.broadcast %cst : f32 to vector<2x256xf32>
    %2 = arith.mulf %0, %1 : vector<2x256xf32>
    %3 = math.tanh %2 : vector<2x256xf32>
    %cst_1 = arith.constant 1.000000e+00 : f32
    %4 = vector.broadcast %cst_1 : f32 to vector<2x256xf32>
    %5 = arith.mulf %3, %4 : vector<2x256xf32>
    %c0_2 = arith.constant 0 : index
    %c0_3 = arith.constant 0 : index
    %6 = vector.load %arg6[%c0_2, %c0_3] : memref<2x256xf32, #tpu.memory_space<vmem>>, vector<2x256xf32>
    tpu.vector_store %arg6[%c0_2, %c0_3], %5 {strides = array<i32>} : memref<2x256xf32, #tpu.memory_space<vmem>>, vector<2x256xf32>,
    %c0_4 = arith.constant 0 : index
    %c0_5 = arith.constant 0 : index
    %7 = vector.load %arg2[%c0_4, %c0_5] : memref<2x256xf32, #tpu.memory_space<vmem>>, vector<2x256xf32>
    %cst_6 = arith.constant 1.000000e-01 : f32
    %8 = vector.broadcast %cst_6 : f32 to vector<2x256xf32>
    %9 = arith.mulf %7, %8 : vector<2x256xf32>
    %c0_7 = arith.constant 0 : index
    %c0_8 = arith.constant 0 : index
    %10 = vector.load %arg7[%c0_7, %c0_8] : memref<2x256xf32, #tpu.memory_space<vmem>>, vector<2x256xf32>
    tpu.vector_store %arg7[%c0_7, %c0_8], %9 {strides = array<i32>} : memref<2x256xf32, #tpu.memory_space<vmem>>, vector<2x256xf32>,
    %c0_9 = arith.constant 0 : index
    %c0_10 = arith.constant 0 : index
    %11 = vector.load %arg3[%c0_9, %c0_10] : memref<2x128xf32, #tpu.memory_space<vmem>>, vector<2x128xf32>
    %c0_11 = arith.constant 0 : index
    %c0_12 = arith.constant 0 : index
    %12 = vector.load %arg4[%c0_11, %c0_12] : memref<2x128xf32, #tpu.memory_space<vmem>>, vector<2x128xf32>
    %c0_13 = arith.constant 0 : index
    %c0_14 = arith.constant 0 : index
    %13 = vector.load %arg5[%c0_13, %c0_14] : memref<2x2xf32, #tpu.memory_space<vmem>>, vector<2x1xf32>
    %c0_15 = arith.constant 0 : index
    %c1 = arith.constant 1 : index
    %14 = vector.load %arg5[%c0_15, %c1] : memref<2x2xf32, #tpu.memory_space<vmem>>, vector<2x1xf32>
    %15 = math.cos %12 : vector<2x128xf32>
    %16 = arith.mulf %11, %15 : vector<2x128xf32>
    %17 = vector.broadcast %13 : vector<2x1xf32> to vector<2x128xf32>
    %18 = arith.addf %17, %16 : vector<2x128xf32>
    %19 = math.sin %12 : vector<2x128xf32>
    %20 = arith.mulf %11, %19 : vector<2x128xf32>
    %21 = vector.broadcast %14 : vector<2x1xf32> to vector<2x128xf32>
    %22 = arith.addf %21, %20 : vector<2x128xf32>
    %23 = tpu.concatenate %18, %22 in 1 : vector<2x128xf32>, vector<2x128xf32> -> vector<2x256xf32>
    %c0_16 = arith.constant 0 : index
    %c0_17 = arith.constant 0 : index
    %24 = vector.load %arg8[%c0_16, %c0_17] : memref<2x256xf32, #tpu.memory_space<vmem>>, vector<2x256xf32>
    tpu.vector_store %arg8[%c0_16, %c0_17], %23 {strides = array<i32>} : memref<2x256xf32, #tpu.memory_space<vmem>>, vector<2x256xf32>,
    return
  }
  func.func @transform_0(%arg0: i32) -> (i32, i32) {
    %c0_i32 = arith.constant 0 : i32
    %c0_i32_0 = arith.constant 0 : i32
    %c0_i32_1 = arith.constant 0 : i32
    return %c0_i32, %c0_i32_0 : i32, i32
  }
  func.func @transform_1(%arg0: i32) -> (i32, i32) {
    %c0_i32 = arith.constant 0 : i32
    %c0_i32_0 = arith.constant 0 : i32
    %c0_i32_1 = arith.constant 0 : i32
    return %c0_i32, %c0_i32_0 : i32, i32
  }
  func.func @transform_2(%arg0: i32) -> (i32, i32) {
    %c0_i32 = arith.constant 0 : i32
    %c0_i32_0 = arith.constant 0 : i32
    %c0_i32_1 = arith.constant 0 : i32
    return %c0_i32, %c0_i32_0 : i32, i32
  }
  func.func @transform_3(%arg0: i32) -> (i32, i32) {
    %c0_i32 = arith.constant 0 : i32
    %c0_i32_0 = arith.constant 0 : i32
    %c0_i32_1 = arith.constant 0 : i32
    return %c0_i32, %c0_i32_0 : i32, i32
  }
  func.func @transform_4(%arg0: i32) -> (i32, i32) {
    %c0_i32 = arith.constant 0 : i32
    %c0_i32_0 = arith.constant 0 : i32
    %c0_i32_1 = arith.constant 0 : i32
    return %c0_i32, %c0_i32_0 : i32, i32
  }
  func.func @transform_5(%arg0: i32) -> (i32, i32) {
    %c0_i32 = arith.constant 0 : i32
    %c0_i32_0 = arith.constant 0 : i32
    %c0_i32_1 = arith.constant 0 : i32
    return %c0_i32, %c0_i32_0 : i32, i32
  }
  func.func @transform_6(%arg0: i32) -> (i32, i32) {
    %c0_i32 = arith.constant 0 : i32
    %c0_i32_0 = arith.constant 0 : i32
    %c0_i32_1 = arith.constant 0 : i32
    return %c0_i32, %c0_i32_0 : i32, i32
  }
  func.func @transform_7(%arg0: i32) -> (i32, i32) {
    %c0_i32 = arith.constant 0 : i32
    %c0_i32_0 = arith.constant 0 : i32
    %c0_i32_1 = arith.constant 0 : i32
    return %c0_i32, %c0_i32_0 : i32, i32
  }
}

</mosaic_0001>

<bundles_post_ra>
// kernel: tpu_custom_call.1
= control target key start
LH: loop header
LB: loop body
LE: loop exit
PB: predicated region body
PF: predicated region fallthrough
CT: control target
= control target key end

     0   :  { %13 = vsyncpa [#allocation3], 0  ;;  %s632_s0 = inlined_call_operand.hbm [shape: f32[2,256], index: 0, kind: input, shape index: {}]   ;;  %s633_s1 = inlined_call_operand.hbm [shape: f32[2,256], index: 1, kind: input, shape index: {}]   ;;  %s634_s2 = inlined_call_operand.vmem [shape: f32[2,128], index: 2, kind: input, shape index: {}]   ;;  %s635_s3 = inlined_call_operand.vmem [shape: f32[2,128], index: 3, kind: input, shape index: {}]   ;;  %s636_s4 = inlined_call_operand.vmem [shape: f32[2,2], index: 4, kind: input, shape index: {}]   ;;  %s637_s5 = inlined_call_operand.hbm [shape: f32[2,256], index: 5, kind: output, shape index: {0}]   ;;  %s638_s6 = inlined_call_operand.hbm [shape: f32[2,256], index: 6, kind: output, shape index: {1}]   ;;  %s639_s7 = inlined_call_operand.hbm [shape: f32[2,256], index: 7, kind: output, shape index: {2}]  }
   0x1   :  { %14 = vsyncpa [#allocation6], 0 }
   0x2   :  { %15 = vsyncpa [#allocation4], 0 }
   0x3   :  { %16 = vsyncpa [#allocation9], 0  ;;  %s486_s24 = smov [#allocation2]   ;;  %s487_s26 = smov [#allocation5]  }
   0x4   :  { %s23_s25 = sshll.u32 %s486_s24, 4  ;;  %s33_s27 = sshll.u32 %s487_s26, 4  ;;  %s24_s25 = int_to_ptr.vmem [resolvable:$true] %s23_s25  ;;  %s34_s27 = int_to_ptr.vmem [resolvable:$true] %s33_s27 }
   0x5   :  { %s368_s30 = scalar_lea.hbm %s632_s0, 64 }
   0x6   :  { %p369_p0 = scmp.ne.s32.totalorder %s632_s0, %s368_s30  ;;  %p372_p1 = scmp.lt.u32.totalorder %s368_s30, %s632_s0 }
   0x8   :  { %p374_p2 = pnand %p372_p1, %p369_p0 }
   0xa   :  { %377 = shalt.err (!%p374_p2)
}
   0xb   :  { %s378_s12 = scalar_lea.vmem %s24_s25, 64  ;;  %p383_p4 = scmp.lt.s32.totalorder %s24_s25, %s24_s25 }
   0xc   :  { %p379_p3 = scmp.ne.s32.totalorder %s24_s25, %s378_s12  ;;  %p384_p5 = scmp.lt.s32.totalorder %s378_s12, %s378_s12 }
   0xe   :  { %p385_p6 = por %p384_p5, %p383_p4 }
  0x10   :  { %p386_p7 = pnand %p385_p6, %p379_p3 }
  0x12   :  { %389 = shalt.err (!%p386_p7)
}
  0x13   :  { %26 = dma.hbm_to_vmem [thread:$0]  %s632_s0, 64, %s24_s25, [#allocation3]  }
  0x14   :  { %s390_s17 = scalar_lea.hbm %s633_s1, 64 }
  0x15   :  { %p391_p8 = scmp.ne.s32.totalorder %s633_s1, %s390_s17  ;;  %p394_p9 = scmp.lt.u32.totalorder %s390_s17, %s633_s1 }
  0x17   :  { %p396_p10 = pnand %p394_p9, %p391_p8 }
  0x19   :  { %399 = shalt.err (!%p396_p10)
}
  0x1a   :  { %s400_s22 = scalar_lea.vmem %s34_s27, 64  ;;  %p405_p12 = scmp.lt.s32.totalorder %s34_s27, %s34_s27 }
  0x1b   :  { %p401_p11 = scmp.ne.s32.totalorder %s34_s27, %s400_s22  ;;  %p406_p13 = scmp.lt.s32.totalorder %s400_s22, %s400_s22 }
  0x1d   :  { %p407_p0 = por %p406_p13, %p405_p12 }
  0x1f   :  { %p408_p1 = pnand %p407_p0, %p401_p11 }
  0x21   :  { %411 = shalt.err (!%p408_p1)
}
  0x22   :  { %36 = dma.hbm_to_vmem [thread:$0]  %s633_s1, 64, %s34_s27, [#allocation6]  }
  0x23   :  { %478 = dma.done.wait [#allocation3], 64  }
  0x24   :  { %479 = vsyncadd [#allocation3], 4294967232 }
  0x25   :  { %480 = dma.done.wait [#allocation6], 64  }
  0x26   :  { %481 = vsyncadd [#allocation6], 4294967232  ;;  %v488_v0 = vmov 0   ;;  %v58_v1 = vld [vmem:[%s636_s4] sm:$0x3]  ;;  %v489_v8 = vmov 1  }
  0x27   :  { %360 = vset.pattern.permute.xlu0 %v488_v0  ;;  %v569_v2 = vld [vmem:[%s635_s3] sm:$0x3]  ;;  %v53_v10 = vld [vmem:[#allocation5] sm:$0xf]  ;;  %s490_s1 = smov [#allocation8]   ;;  %s491_s4 = smov [#allocation7]  }
  0x28   :  { %165 = vperm.xlu0 %360, %v58_v1   ;;  %v62_v3 = vand.u32 2139095040, %v569_v2  ;;  %v49_v4 = vld [vmem:[#allocation2] sm:$0xf]  ;;  %v59_v7 = vand.u32 2147483647, %v569_v2  ;;  %s307_s3 = sshll.u32 %s490_s1, 4  ;;  %s308_s3 = int_to_ptr.vmem [resolvable:$true] %s307_s3 }
  0x29   :  { %v50_v5 = vmul.f32 0.005, %v49_v4  ;;  %v54_v12 = vmul.f32 0.1, %v53_v10  ;;  %s297_s27 = sshll.u32 %s491_s4, 4  ;;  %s412_s29 = scalar_lea.vmem %s308_s3, 64  ;;  %s298_s27 = int_to_ptr.vmem [resolvable:$true] %s297_s27 }
  0x2a   :  { %v63_v6 = vshrl.u32 %v62_v3, 23  ;;  %v66_v13 = vand.u32 8388607, %v59_v7  ;;  %p413_p2 = scmp.ne.s32.totalorder %s308_s3, %s412_s29  ;;  %p417_p3 = scmp.lt.s32.totalorder %s308_s3, %s308_s3 }
  0x2b   :  { %362 = vtanh.f32 %v50_v5  ;;  %55 = vst [vmem:[#allocation8] sm:$0xf] %v54_v12  ;;  %p418_p4 = scmp.lt.s32.totalorder %s412_s29, %s412_s29 }
  0x2c   :  { %361 = vset.pattern.permute.xlu0 %v489_v8  ;;  %v334_v9 = vadd.s32 4294967169, %v63_v6 }
  0x2d   :  { %275 = vperm.xlu0 %361, %v58_v1   ;;  %p419_p5 = por %p418_p4, %p417_p3 }
  0x2e   :  { %v69_v11 = vadd.s32 1, %v334_v9 }
  0x2f   :  { %p420_p6 = pnand %p419_p5, %p413_p2 }
  0x30   :  { %vm70_vm0 = vcmp.gt.s32.totalorder %v69_v11, 0 }
  0x31   :  { %v71_v14 = vsel %vm70_vm0, %v69_v11, 0 }
  0x32   :  { %423 = shalt.err (!%p420_p6)
}
  0x33   :  { %s424_s9 = scalar_lea.hbm %s638_s6, 64 }
  0x34   :  { %p425_p7 = scmp.ne.s32.totalorder %s638_s6, %s424_s9  ;;  %p428_p8 = scmp.lt.u32.totalorder %s424_s9, %s638_s6 }
  0x36   :  { %p430_p9 = pnand %p428_p8, %p425_p7 }
  0x38   :  { %433 = shalt.err (!%p430_p9)
}
  0x39   :  { %310 = dma.vmem_to_hbm [thread:$0]  %s308_s3, 64, %s638_s6, [#allocation9]   ;;  %v73_v15 = vand.u32 31, %v71_v14  ;;  %v67_v16 = vor.u32 8388608, %v66_v13  ;;  %v72_v17 = vshrl.u32 %v71_v14, 5  ;;  %v363_v25 = vpop.eup %362 }
  0x3a   :  { %v492_v19 = vmov 683565275   ;;  %v493_v21 = vmov 2475754826   ;;  %v494_v23 = vmov 2131351028   ;;  %p439_p11 = scmp.lt.s32.totalorder %s298_s27, %s298_s27 }
  0x3b   :  { %v74_v18 = vsub.s32 32, %v73_v15  ;;  %v76_v20 = vshll.u32 %v492_v19, %v73_v15  ;;  %v79_v22 = vshll.u32 %v493_v21, %v73_v15  ;;  %v82_v24 = vshll.u32 %v494_v23, %v73_v15  ;;  %52 = vst [vmem:[#allocation7] sm:$0xf] %v363_v25  ;;  %s434_s6 = scalar_lea.vmem %s298_s27, 64 }
  0x3c   :  { %v495_v26 = vmov 2102212464   ;;  %v496_v28 = vmov 920167782   ;;  %v497_v35 = vmov 1326507024   ;;  %p435_p10 = scmp.ne.s32.totalorder %s298_s27, %s434_s6  ;;  %p440_p12 = scmp.lt.s32.totalorder %s434_s6, %s434_s6 }
  0x3d   :  { %v85_v27 = vshll.u32 %v495_v26, %v73_v15  ;;  %v88_v29 = vshll.u32 %v496_v28, %v73_v15  ;;  %v75_v30 = vshrl.u32 %v492_v19, %v74_v18  ;;  %v77_v31 = vshrl.u32 %v493_v21, %v74_v18 }
  0x3e   :  { %v80_v32 = vshrl.u32 %v494_v23, %v74_v18  ;;  %v83_v33 = vshrl.u32 %v495_v26, %v74_v18  ;;  %v86_v34 = vshrl.u32 %v496_v28, %v74_v18  ;;  %v89_v36 = vshrl.u32 %v497_v35, %v74_v18  ;;  %p441_p13 = por %p440_p12, %p439_p11 }
  0x3f   :  { %vm91_vm1 = vcmp.lt.s32.totalorder %v72_v17, 1  ;;  %v107_v37 = vshll.u32 %v67_v16, 8 }
  0x40   :  { %p442_p0 = pnand %p441_p13, %p435_p10 }
  0x42   :  { %445 = shalt.err (!%p442_p0)
}
  0x43   :  { %s446_s18 = scalar_lea.hbm %s637_s5, 64 }
  0x44   :  { %p447_p1 = scmp.ne.s32.totalorder %s637_s5, %s446_s18  ;;  %p450_p2 = scmp.lt.u32.totalorder %s446_s18, %s637_s5 }
  0x46   :  { %p452_p3 = pnand %p450_p2, %p447_p1 }
  0x48   :  { %455 = shalt.err (!%p452_p3)
}
  0x49   :  { %300 = dma.vmem_to_hbm [thread:$0]  %s298_s27, 64, %s637_s5, [#allocation4]   ;;  %v78_v38 = vor.u32 %v77_v31, %v76_v20  ;;  %v81_v39 = vor.u32 %v80_v32, %v79_v22  ;;  %v84_v40 = vor.u32 %v83_v33, %v82_v24  ;;  %vm94_vm2 = vcmp.lt.s32.totalorder %v72_v17, 4 }
  0x4a   :  { %v87_v41 = vor.u32 %v86_v34, %v85_v27  ;;  %v90_v42 = vor.u32 %v89_v36, %v88_v29  ;;  %vm92_vm3 = vcmp.lt.s32.totalorder %v72_v17, 2  ;;  %vm93_vm4 = vcmp.lt.s32.totalorder %v72_v17, 3  ;;  %s498_s25 = smov [#allocation10]  }
  0x4b   :  { %v95_v43 = vsel %vm91_vm1, %v75_v30, %v78_v38  ;;  %v96_v44 = vsel %vm94_vm2, %v84_v40, 2102212464  ;;  %v99_v45 = vsel %vm91_vm1, %v78_v38, %v81_v39  ;;  %v103_v46 = vsel %vm91_vm1, %v81_v39, %v84_v40  ;;  %s317_s26 = sshll.u32 %s498_s25, 4  ;;  %s318_s26 = int_to_ptr.vmem [resolvable:$true] %s317_s26 }
  0x4c   :  { %v97_v47 = vsel %vm93_vm4, %v81_v39, %v96_v44  ;;  %v100_v48 = vsel %vm94_vm2, %v87_v41, 920167782  ;;  %v104_v49 = vsel %vm94_vm2, %v90_v42, 1326507024  ;;  %vm61_vm7 = vcmp.lt.s32.totalorder %v569_v2, 0  ;;  %s456_s28 = scalar_lea.vmem %s318_s26, 64  ;;  %p461_p5 = scmp.lt.s32.totalorder %s318_s26, %s318_s26 }
  0x4d   :  { %v101_v50 = vsel %vm93_vm4, %v84_v40, %v100_v48  ;;  %v105_v51 = vsel %vm93_vm4, %v87_v41, %v104_v49  ;;  %v98_v52 = vsel %vm92_vm3, %v95_v43, %v97_v47  ;;  %vm60_vm8 = vcmp.le.f32.partialorder %v59_v7, 0.7853982  ;;  %v56_v40 = vld [vmem:[%s634_s2] sm:$0x3]  ;;  %p457_p4 = scmp.ne.s32.totalorder %s318_s26, %s456_s28  ;;  %p462_p6 = scmp.lt.s32.totalorder %s456_s28, %s456_s28 }
  0x4e   :  { %v102_v53 = vsel %vm92_vm3, %v99_v45, %v101_v50  ;;  %v106_v54 = vsel %vm92_vm3, %v103_v46, %v105_v51  ;;  %v114_v59 = vmul.u32 %v107_v37, %v98_v52  ;;  %vm151_vm15 = vweird.f32 %v569_v2 }
  0x4f   :  { %v602_v55 = vmul.u32.u64.low %v107_v37, %v106_v54  ;;  %v603_v56 = vmul.u32.u64.high %v107_v37, %v106_v54, %v602_v55  ;;  %v605_v57 = vmul.u32.u64.low %v107_v37, %v102_v53  ;;  %v606_v58 = vmul.u32.u64.high %v107_v37, %v102_v53, %v605_v57  ;;  %p463_p7 = por %p462_p6, %p461_p5 }
  0x51   :  { %vm116_vm5 = vc.u32 %v603_v56, %v605_v57  ;;  %v117_v60 = vadd.s32 1, %v606_v58  ;;  %v115_v11 = vadd.s32 %v605_v57, %v603_v56  ;;  %p464_p8 = pnand %p463_p7, %p457_p4 }
  0x53   :  { %v118_v61 = vsel %vm116_vm5, %v117_v60, %v606_v58 }
  0x54   :  { %v119_v62 = vadd.s32 %v118_v61, %v114_v59 }
  0x56   :  { %v120_v63 = vadd.s32 536870912, %v119_v62 }
  0x58   :  { %v121_v0 = vshrl.u32 %v120_v63, 30 }
  0x5a   :  { %v122_v1 = vshll.u32 %v121_v0, 30  ;;  %v145_v25 = vsub.s32 4, %v121_v0 }
  0x5c   :  { %v123_v3 = vsub.s32 %v119_v62, %v122_v1  ;;  %v146_v26 = vsel %vm61_vm7, %v145_v25, %v121_v0 }
  0x5d   :  { %v148_v27 = vsel %vm60_vm8, 0, %v146_v26 }
  0x5e   :  { %v125_v4 = vsub.s32 0, %v123_v3  ;;  %v262_v28 = vadd.s32 3, %v148_v27  ;;  %v152_v31 = vand.u32 3, %v148_v27 }
  0x60   :  { %v335_v5 = vmin.u32 %v125_v4, %v123_v3  ;;  %v263_v32 = vand.u32 3, %v262_v28  ;;  %vm154_vm9 = vcmp.eq.s32.totalorder %v152_v31, 0  ;;  %vm157_vm10 = vcmp.eq.s32.totalorder %v152_v31, 2 }
  0x61   :  { %vm153_vm13 = vcmp.lt.s32.totalorder %v152_v31, 2 }
  0x62   :  { %v127_v6 = vclz %v335_v5  ;;  %vm265_vm11 = vcmp.eq.s32.totalorder %v263_v32, 0  ;;  %vm268_vm12 = vcmp.eq.s32.totalorder %v263_v32, 2  ;;  %vm264_vm14 = vcmp.lt.s32.totalorder %v263_v32, 2 }
  0x64   :  { %v336_v8 = vadd.s32 4294967294, %v127_v6 }
  0x66   :  { %vm337_vm6 = vcmp.lt.s32.totalorder %v336_v8, 0 }
  0x67   :  { %v130_v9 = vsel %vm337_vm6, 0, %v336_v8 }
  0x68   :  { %v135_v10 = vsub.s32 4294967266, %v130_v9  ;;  %v131_v12 = vsub.s32 32, %v130_v9  ;;  %v132_v14 = vshll.u32 %v123_v3, %v130_v9 }
  0x6a   :  { %v136_v13 = vadd.s32 127, %v135_v10  ;;  %v133_v15 = vshrl.u32 %v115_v11, %v131_v12 }
  0x6c   :  { %v137_v16 = vshll.u32 %v136_v13, 23  ;;  %v134_v17 = vor.u32 %v133_v15, %v132_v14 }
  0x6e   :  { %v138_v18 = vor.u32 4788187, %v137_v16  ;;  %v141_v20 = vcvt.s32.f32 %v134_v17 }
  0x70   :  { %v139_v19 = vand.u32 2147483647, %v138_v18 }
  0x72   :  { %v142_v21 = vmul.f32 %v141_v20, %v139_v19 }
  0x74   :  { %v143_v22 = vxor.u32 2147483648, %v142_v21 }
  0x76   :  { %v144_v23 = vsel %vm61_vm7, %v143_v22, %v142_v21 }
  0x77   :  { %v147_v24 = vsel %vm60_vm8, %v569_v2, %v144_v23 }
  0x78   :  { %364 = vcosq.f32 %v147_v24 }
  0x79   :  { %366 = vsinq.f32 %v147_v24 }
  0x82   :  { %v365_v29 = vpop.eup %364 }
  0x83   :  { %v367_v30 = vpop.eup %366  ;;  %v158_v34 = vxor.u32 2147483648, %v365_v29 }
  0x84   :  { %v155_v33 = vxor.u32 2147483648, %v367_v30 }
  0x85   :  { %v159_v35 = vsel %vm157_vm10, %v158_v34, %v367_v30  ;;  %v270_v37 = vsel %vm268_vm12, %v158_v34, %v367_v30 }
  0x86   :  { %v156_v7 = vsel %vm154_vm9, %v365_v29, %v155_v33  ;;  %v267_v36 = vsel %vm265_vm11, %v365_v29, %v155_v33 }
  0x87   :  { %v160_v38 = vsel %vm153_vm13, %v156_v7, %v159_v35  ;;  %v271_v39 = vsel %vm264_vm14, %v267_v36, %v270_v37 }
  0x88   :  { %v161_v41 = vsel %vm151_vm15, nan, %v160_v38  ;;  %v272_v42 = vsel %vm151_vm15, nan, %v271_v39 }
  0x89   :  { %v162_v44 = vmul.f32 %v161_v41, %v56_v40  ;;  %v273_v45 = vmul.f32 %v272_v42, %v56_v40 }
  0xa7   :  { %v166_v43 = vpop.permute.xlu0 %165 }
  0xa8   :  { %v168_v47 = vadd.f32 %v166_v43, %v162_v44 }
  0xac   :  { %v276_v46 = vpop.permute.xlu0 %275 }
  0xad   :  { %v278_v48 = vadd.f32 %v276_v46, %v273_v45 }
  0xaf   :  { %v281_v49 = vcombine.low %v168_v47, %v278_v48 }
  0xb1   :  { %342 = vst.sshfl [vmem:[#allocation10] sm:$0x33 pattern:$0x76325410] %v281_v49 }
  0xb2   :  { %467 = shalt.err (!%p464_p8)
}
  0xb3   :  { %s468_s3 = scalar_lea.hbm %s639_s7, 64 }
  0xb4   :  { %p469_p9 = scmp.ne.s32.totalorder %s639_s7, %s468_s3  ;;  %p472_p10 = scmp.lt.u32.totalorder %s468_s3, %s639_s7 }
  0xb6   :  { %p474_p11 = pnand %p472_p10, %p469_p9 }
  0xb8   :  { %477 = shalt.err (!%p474_p11)
}
  0xb9   :  { %320 = dma.vmem_to_hbm [thread:$0]  %s318_s26, 64, %s639_s7, [#allocation9]  }
  0xba   :  { %482 = dma.done.wait [#allocation4], 64  }
  0xbb   :  { %483 = vsyncadd [#allocation4], 4294967232 }
  0xbc   :  { %484 = dma.done.wait [#allocation9], 128  }
  0xbd   :  { %485 = vsyncadd [#allocation9], 4294967168 }
  0xbe   :  { %330 = vsyncpa [#allocation3], 1 }
  0xbf   :  { %331 = vsyncpa [#allocation6], 1 }
  0xc0   :  { %332 = vsyncpa [#allocation4], 1 }
  0xc1   :  { %333 = vsyncpa [#allocation9], 1 }

</bundles_post_ra>
